<compile_context>
chip_gen: v7x
topology: tpu7x:2x2x1
jax: 0.10.0
libtpu: 0.0.40
codegen_flags: <defaults>
</compile_context>

<pallas_src>
import functools

import jax
import jax.numpy as jnp
from jax.experimental import pallas as pl
from jax.experimental.pallas import tpu as pltpu


def _round_up(n, m):
    return ((n + m - 1) // m) * m


def _num_tensorcores_per_chip():
    """Best-effort TensorCores-per-chip detection (v7x / v4 / v5p have 2)."""
    try:
        kind = jax.devices()[0].device_kind.lower()
    except Exception:
        return 1
    if ("v7" in kind) or ("v4" in kind) or ("v5p" in kind):
        return 2
    return 1


def mlp_kernel(x_ref, w1_ref, b1_ref, w2_ref, b2_ref, w3_ref, b3_ref,
               w4t_ref, b4_ref, o_ref, *, compute_dtype):
    cdt = compute_dtype
    # In-kernel cast of the x tile (cheap VPU work hidden under the DMA);
    # x stays in its HBM dtype so no extra wrapper-side HBM round-trip.
    x = x_ref[...].astype(cdt)
    # fc1 + relu  (MXU matmul, f32 accumulation; bias/ReLU in f32 on the VPU)
    h = jnp.dot(x, w1_ref[...], preferred_element_type=jnp.float32)
    h = jnp.maximum(h + b1_ref[...], 0.0)
    # fc2 + relu
    h = jnp.dot(h.astype(cdt), w2_ref[...], preferred_element_type=jnp.float32)
    h = jnp.maximum(h + b2_ref[...], 0.0)
    # fc3 + relu
    h = jnp.dot(h.astype(cdt), w3_ref[...], preferred_element_type=jnp.float32)
    h = jnp.maximum(h + b3_ref[...], 0.0)
    # fc4 (single output feature, no activation): broadcast-multiply + lane
    # reduce (VPU + XLU) in f32 — no MXU op, no output-lane padding; the
    # store is a narrow (bt, 1) vst which is negligible next to the x reads.
    o = jnp.sum(h * w4t_ref[...], axis=-1, keepdims=True) + b4_ref[...]
    o_ref[...] = o.astype(o_ref.dtype)


def prepare_params(params, compute_dtype=jnp.float32):
    """One-time weight prep (hoisted out of the forward path).

    Weights for fc1..fc3 are cast to the compute dtype; fc4's single output
    column is kept as a (1, 32) f32 row for the in-kernel lane reduce; all
    biases stay f32 (they are added to f32 MXU accumulators).
    """
    (w1, b1), (w2, b2), (w3, b3), (w4, b4) = params
    cdt = compute_dtype
    w1c, w2c, w3c = (jnp.asarray(w, cdt) for w in (w1, w2, w3))
    w4t = jnp.asarray(w4, jnp.float32).reshape(-1)[None, :]          # (1, 32)
    b1f, b2f, b3f = (jnp.asarray(b, jnp.float32).reshape(1, -1)
                     for b in (b1, b2, b3))
    b4f = jnp.asarray(b4, jnp.float32).reshape(1, 1)                  # (1, 1)
    return (w1c, b1f, w2c, b2f, w3c, b3f, w4t, b4f, cdt)


def mlp_forward(x, prepped, *, batch_tile=1024):
    """fc1->relu->fc2->relu->fc3->relu->fc4 in a single Pallas kernel,
    tiled over the batch dimension.  Handles any B (last tile is clamped by
    Pallas; no wrapper-side padding or copies)."""
    w1c, b1f, w2c, b2f, w3c, b3f, w4t, b4f, cdt = prepped
    B, D_in = x.shape
    assert D_in == w1c.shape[0]
    out_dtype = x.dtype

    # Batch tile: large (default 1024) so the per-grid-step overhead
    # (~0.35 us) is amortized and the x DMA is HBM-roofline sized; rounded to
    # the 8-row sublane granule and capped at 2048 so double-buffered x plus
    # the output stays well inside the default scoped-VMEM limit on v7x.
    bt = min(batch_tile, 2048, _round_up(B, 8))
    bt = max(_round_up(bt, 8), 8)
    # Only on 2-TensorCore chips (v7x / v4 / v5p): make sure the "parallel"
    # batch axis has >= 2 grid steps so both cores get work.  On 1-TC chips
    # (v5e / v6e) a forced split would just add a serial grid step.
    if _num_tensorcores_per_chip() >= 2 and pl.cdiv(B, bt) < 2 and bt >= 16:
        bt = _round_up(max(bt // 2, 8), 8)
    num_tiles = pl.cdiv(B, bt)

    # Weights/biases are tiny and fully VMEM-resident (constant block index).
    def weight_spec(arr):
        return pl.BlockSpec(arr.shape, lambda i: (0, 0))

    out = pl.pallas_call(
        functools.partial(mlp_kernel, compute_dtype=cdt),
        out_shape=jax.ShapeDtypeStruct((B, 1), out_dtype),
        grid_spec=pltpu.PrefetchScalarGridSpec(
            num_scalar_prefetch=0,
            grid=(num_tiles,),
            in_specs=[
                pl.BlockSpec((bt, D_in), lambda i: (i, 0)),   # x (batch-tiled)
                weight_spec(w1c), weight_spec(b1f),
                weight_spec(w2c), weight_spec(b2f),
                weight_spec(w3c), weight_spec(b3f),
                weight_spec(w4t), weight_spec(b4f),
            ],
            out_specs=pl.BlockSpec((bt, 1), lambda i: (i, 0)),
        ),
        compiler_params=pltpu.CompilerParams(
            dimension_semantics=("parallel",)),
    )(x, w1c, b1f, w2c, b2f, w3c, b3f, w4t, b4f)

    return out


def init_linear_params(key, in_features, out_features):
    """Deterministic init mimicking PyTorch nn.Linear default:
    U(-1/sqrt(in), 1/sqrt(in)) for both weight and bias."""
    kw, kb = jax.random.split(key)
    bound = 1.0 / jnp.sqrt(jnp.float32(in_features))
    # Stored as (in, out) so the kernel does x @ W (PyTorch stores (out, in)).
    w = jax.random.uniform(kw, (in_features, out_features), jnp.float32,
                           minval=-bound, maxval=bound)
    b = jax.random.uniform(kb, (1, out_features), jnp.float32,
                           minval=-bound, maxval=bound)
    return w, b


def reference_forward(x, params):
    h = x
    for idx, (w, b) in enumerate(params):
        h = h @ w + b
        if idx < len(params) - 1:
            h = jnp.maximum(h, 0.0)
    return h


if __name__ == "__main__":
    key = jax.random.PRNGKey(0)
    k_x, k_x2, k1, k2, k3, k4 = jax.random.split(key, 6)

    params = [
        init_linear_params(k1, 320, 64),
        init_linear_params(k2, 64, 128),
        init_linear_params(k3, 128, 32),
        init_linear_params(k4, 32, 1),
    ]

    # Hoisted, one-time weight prep (f32 and bf16 compute variants).
    prepped_f32 = prepare_params(params, jnp.float32)
    prepped_bf16 = prepare_params(params, jnp.bfloat16)

    # Small batch (single small tile).
    B1 = 8
    x1 = jax.random.normal(k_x, (B1, 320), jnp.float32)
    out1 = jax.block_until_ready(mlp_forward(x1, prepped_f32))
    ref1 = reference_forward(x1, params)
    assert out1.shape == (B1, 1), out1.shape
    assert jnp.allclose(out1, ref1, atol=1e-4, rtol=1e-4), "mismatch (B=8, f32)"

    # Non-tile-multiple batch: exercises the Pallas-clamped last block
    # (no wrapper-side padding copy).
    B2 = 300
    x2 = jax.random.normal(k_x2, (B2, 320), jnp.float32)
    out2 = jax.block_until_ready(mlp_forward(x2, prepped_f32))
    ref2 = reference_forward(x2, params)
    assert out2.shape == (B2, 1), out2.shape
    assert jnp.allclose(out2, ref2, atol=1e-4, rtol=1e-4), "mismatch (B=300, f32)"

    # bf16 compute path (weights bf16 in HBM; x cast in-kernel; f32 accum).
    out2_bf16 = jax.block_until_ready(mlp_forward(x2, prepped_bf16))
    assert out2_bf16.shape == (B2, 1), out2_bf16.shape
    assert jnp.allclose(out2_bf16, ref2, atol=5e-2, rtol=5e-2), \
        "mismatch (B=300, bf16)"

    print("KERNEL_OK")
</pallas_src>

<mosaic_0001>
module attributes {stable_mosaic.version = 11 : i64} {
  func.func @mlp_kernel(%arg0: i32, %arg1: memref<8x320xf32, #tpu.memory_space<vmem>>, %arg2: memref<320x64xf32, #tpu.memory_space<vmem>>, %arg3: memref<1x64xf32, #tpu.memory_space<vmem>>, %arg4: memref<64x128xf32, #tpu.memory_space<vmem>>, %arg5: memref<1x128xf32, #tpu.memory_space<vmem>>, %arg6: memref<128x32xf32, #tpu.memory_space<vmem>>, %arg7: memref<1x32xf32, #tpu.memory_space<vmem>>, %arg8: memref<1x32xf32, #tpu.memory_space<vmem>>, %arg9: memref<1x1xf32, #tpu.memory_space<vmem>>, %arg10: memref<8x1xf32, #tpu.memory_space<vmem>>) attributes {dimension_semantics = [#tpu.dimension_semantics<parallel>], iteration_bounds = array<i64: 1>, scalar_prefetch = 0 : i64, scratch_operands = 0 : i64, tpu.core_type = #tpu.core_type<tc>, window_params = [{transform_indices = @transform_0, window_bounds = array<i64: 8, 320>}, {pipeline_mode = #tpu.pipeline_mode<synchronous>, transform_indices = @transform_1, window_bounds = array<i64: 320, 64>}, {pipeline_mode = #tpu.pipeline_mode<synchronous>, transform_indices = @transform_2, window_bounds = array<i64: 1, 64>}, {pipeline_mode = #tpu.pipeline_mode<synchronous>, transform_indices = @transform_3, window_bounds = array<i64: 64, 128>}, {pipeline_mode = #tpu.pipeline_mode<synchronous>, transform_indices = @transform_4, window_bounds = array<i64: 1, 128>}, {pipeline_mode = #tpu.pipeline_mode<synchronous>, transform_indices = @transform_5, window_bounds = array<i64: 128, 32>}, {pipeline_mode = #tpu.pipeline_mode<synchronous>, transform_indices = @transform_6, window_bounds = array<i64: 1, 32>}, {pipeline_mode = #tpu.pipeline_mode<synchronous>, transform_indices = @transform_7, window_bounds = array<i64: 1, 32>}, {pipeline_mode = #tpu.pipeline_mode<synchronous>, transform_indices = @transform_8, window_bounds = array<i64: 1, 1>}, {transform_indices = @transform_9, window_bounds = array<i64: 8, 1>}]} {
    %c0 = arith.constant 0 : index
    %c0_0 = arith.constant 0 : index
    %0 = vector.load %arg1[%c0, %c0_0] : memref<8x320xf32, #tpu.memory_space<vmem>>, vector<8x320xf32>
    %c0_1 = arith.constant 0 : index
    %c0_2 = arith.constant 0 : index
    %1 = vector.load %arg2[%c0_1, %c0_2] : memref<320x64xf32, #tpu.memory_space<vmem>>, vector<320x64xf32>
    %cst = arith.constant dense<0.000000e+00> : vector<8x64xf32>
    %2 = tpu.matmul %0, %1, %cst {dimension_numbers = #tpu.dot_dimension_numbers<[1], [0], [0], [1], [0, 0, 1, 1], [], []>} : vector<8x320xf32>, vector<320x64xf32>, vector<8x64xf32> -> vector<8x64xf32>
    %c0_3 = arith.constant 0 : index
    %c0_4 = arith.constant 0 : index
    %3 = vector.load %arg3[%c0_3, %c0_4] : memref<1x64xf32, #tpu.memory_space<vmem>>, vector<1x64xf32>
    %4 = vector.broadcast %3 : vector<1x64xf32> to vector<8x64xf32>
    %5 = arith.addf %2, %4 : vector<8x64xf32>
    %cst_5 = arith.constant 0.000000e+00 : f32
    %6 = vector.broadcast %cst_5 : f32 to vector<8x64xf32>
    %7 = arith.maximumf %5, %6 : vector<8x64xf32>
    %c0_6 = arith.constant 0 : index
    %c0_7 = arith.constant 0 : index
    %8 = vector.load %arg4[%c0_6, %c0_7] : memref<64x128xf32, #tpu.memory_space<vmem>>, vector<64x128xf32>
    %cst_8 = arith.constant dense<0.000000e+00> : vector<8x128xf32>
    %9 = tpu.matmul %7, %8, %cst_8 {dimension_numbers = #tpu.dot_dimension_numbers<[1], [0], [0], [1], [0, 0, 1, 1], [], []>} : vector<8x64xf32>, vector<64x128xf32>, vector<8x128xf32> -> vector<8x128xf32>
    %c0_9 = arith.constant 0 : index
    %c0_10 = arith.constant 0 : index
    %10 = vector.load %arg5[%c0_9, %c0_10] : memref<1x128xf32, #tpu.memory_space<vmem>>, vector<1x128xf32>
    %11 = vector.broadcast %10 : vector<1x128xf32> to vector<8x128xf32>
    %12 = arith.addf %9, %11 : vector<8x128xf32>
    %cst_11 = arith.constant 0.000000e+00 : f32
    %13 = vector.broadcast %cst_11 : f32 to vector<8x128xf32>
    %14 = arith.maximumf %12, %13 : vector<8x128xf32>
    %c0_12 = arith.constant 0 : index
    %c0_13 = arith.constant 0 : index
    %15 = vector.load %arg6[%c0_12, %c0_13] : memref<128x32xf32, #tpu.memory_space<vmem>>, vector<128x32xf32>
    %cst_14 = arith.constant dense<0.000000e+00> : vector<8x32xf32>
    %16 = tpu.matmul %14, %15, %cst_14 {dimension_numbers = #tpu.dot_dimension_numbers<[1], [0], [0], [1], [0, 0, 1, 1], [], []>} : vector<8x128xf32>, vector<128x32xf32>, vector<8x32xf32> -> vector<8x32xf32>
    %c0_15 = arith.constant 0 : index
    %c0_16 = arith.constant 0 : index
    %17 = vector.load %arg7[%c0_15, %c0_16] : memref<1x32xf32, #tpu.memory_space<vmem>>, vector<1x32xf32>
    %18 = vector.broadcast %17 : vector<1x32xf32> to vector<8x32xf32>
    %19 = arith.addf %16, %18 : vector<8x32xf32>
    %cst_17 = arith.constant 0.000000e+00 : f32
    %20 = vector.broadcast %cst_17 : f32 to vector<8x32xf32>
    %21 = arith.maximumf %19, %20 : vector<8x32xf32>
    %c0_18 = arith.constant 0 : index
    %c0_19 = arith.constant 0 : index
    %22 = vector.load %arg8[%c0_18, %c0_19] : memref<1x32xf32, #tpu.memory_space<vmem>>, vector<1x32xf32>
    %23 = vector.broadcast %22 : vector<1x32xf32> to vector<8x32xf32>
    %24 = arith.mulf %21, %23 : vector<8x32xf32>
    %cst_20 = arith.constant dense<0.000000e+00> : vector<8xf32>
    %25 = vector.multi_reduction <add>, %24, %cst_20 [1] : vector<8x32xf32> to vector<8xf32>
    %26 = vector.shape_cast %25 : vector<8xf32> to vector<8x1xf32>
    %c0_21 = arith.constant 0 : index
    %c0_22 = arith.constant 0 : index
    %27 = vector.load %arg9[%c0_21, %c0_22] : memref<1x1xf32, #tpu.memory_space<vmem>>, vector<1x1xf32>
    %28 = vector.broadcast %27 : vector<1x1xf32> to vector<8x1xf32>
    %29 = arith.addf %26, %28 : vector<8x1xf32>
    %c0_23 = arith.constant 0 : index
    %c0_24 = arith.constant 0 : index
    %30 = vector.load %arg10[%c0_23, %c0_24] : memref<8x1xf32, #tpu.memory_space<vmem>>, vector<8x1xf32>
    tpu.vector_store %arg10[%c0_23, %c0_24], %29 {strides = array<i32>} : memref<8x1xf32, #tpu.memory_space<vmem>>, vector<8x1xf32>,
    return
  }
  func.func @transform_0(%arg0: i32) -> (i32, i32) {
    %c0_i32 = arith.constant 0 : i32
    %c0_i32_0 = arith.constant 0 : i32
    return %arg0, %c0_i32 : i32, i32
  }
  func.func @transform_1(%arg0: i32) -> (i32, i32) {
    %c0_i32 = arith.constant 0 : i32
    %c0_i32_0 = arith.constant 0 : i32
    %c0_i32_1 = arith.constant 0 : i32
    return %c0_i32, %c0_i32_0 : i32, i32
  }
  func.func @transform_2(%arg0: i32) -> (i32, i32) {
    %c0_i32 = arith.constant 0 : i32
    %c0_i32_0 = arith.constant 0 : i32
    %c0_i32_1 = arith.constant 0 : i32
    return %c0_i32, %c0_i32_0 : i32, i32
  }
  func.func @transform_3(%arg0: i32) -> (i32, i32) {
    %c0_i32 = arith.constant 0 : i32
    %c0_i32_0 = arith.constant 0 : i32
    %c0_i32_1 = arith.constant 0 : i32
    return %c0_i32, %c0_i32_0 : i32, i32
  }
  func.func @transform_4(%arg0: i32) -> (i32, i32) {
    %c0_i32 = arith.constant 0 : i32
    %c0_i32_0 = arith.constant 0 : i32
    %c0_i32_1 = arith.constant 0 : i32
    return %c0_i32, %c0_i32_0 : i32, i32
  }
  func.func @transform_5(%arg0: i32) -> (i32, i32) {
    %c0_i32 = arith.constant 0 : i32
    %c0_i32_0 = arith.constant 0 : i32
    %c0_i32_1 = arith.constant 0 : i32
    return %c0_i32, %c0_i32_0 : i32, i32
  }
  func.func @transform_6(%arg0: i32) -> (i32, i32) {
    %c0_i32 = arith.constant 0 : i32
    %c0_i32_0 = arith.constant 0 : i32
    %c0_i32_1 = arith.constant 0 : i32
    return %c0_i32, %c0_i32_0 : i32, i32
  }
  func.func @transform_7(%arg0: i32) -> (i32, i32) {
    %c0_i32 = arith.constant 0 : i32
    %c0_i32_0 = arith.constant 0 : i32
    %c0_i32_1 = arith.constant 0 : i32
    return %c0_i32, %c0_i32_0 : i32, i32
  }
  func.func @transform_8(%arg0: i32) -> (i32, i32) {
    %c0_i32 = arith.constant 0 : i32
    %c0_i32_0 = arith.constant 0 : i32
    %c0_i32_1 = arith.constant 0 : i32
    return %c0_i32, %c0_i32_0 : i32, i32
  }
  func.func @transform_9(%arg0: i32) -> (i32, i32) {
    %c0_i32 = arith.constant 0 : i32
    %c0_i32_0 = arith.constant 0 : i32
    return %arg0, %c0_i32 : i32, i32
  }
}

</mosaic_0001>

<bundles_post_ra>
// kernel: tpu_custom_call.1
= control target key start
LH: loop header
LB: loop body
LE: loop exit
PB: predicated region body
PF: predicated region fallthrough
CT: control target
= control target key end

     0   :  { %v671_v3 = vmov 0.0|0.0   ;;  %vm672_vm0 = vmmov 0   ;;  %v673_v4 = vmov 0.0   ;;  %vm84_vm1 = vcmask 523264   ;;  %s967_s1 = inlined_call_operand.vmem [shape: f32[320,64], index: 1, kind: input, shape index: {}]   ;;  %s968_s0 = inlined_call_operand.vmem [shape: f32[8,320], index: 0, kind: input, shape index: {}]   ;;  %s969_s3 = inlined_call_operand.vmem [shape: f32[64,128], index: 3, kind: input, shape index: {}]   ;;  %s970_s5 = inlined_call_operand.vmem [shape: f32[128,32], index: 5, kind: input, shape index: {}]   ;;  %s971_s2 = inlined_call_operand.vmem [shape: f32[1,64], index: 2, kind: input, shape index: {}]   ;;  %s972_s4 = inlined_call_operand.vmem [shape: f32[1,128], index: 4, kind: input, shape index: {}]   ;;  %s973_s8 = inlined_call_operand.<no memory space> [shape: f32[1,1], index: 8, kind: input, shape index: {}]   ;;  %s974_s6 = inlined_call_operand.vmem [shape: f32[1,32], index: 6, kind: input, shape index: {}]   ;;  %s975_s7 = inlined_call_operand.vmem [shape: f32[1,32], index: 7, kind: input, shape index: {}]   ;;  %s976_s9 = inlined_call_operand.vmem [shape: f32[8,1], index: 9, kind: output, shape index: {}]  }
   0x1   :  { %v53_v0 = vld [vmem:[%s967_s1 + $0x80] sm:$0xff]  ;;  %v54_v1 = vld [vmem:[%s967_s1 + $0x88] sm:$0xff]  ;;  %620 = vmatprep.subr.bf16.mxu1 %v671_v3  ;;  %531 = vmatprep.mubr.msk.f32.mxu1 %vm672_vm0, %v673_v4  ;;  %v55_v7 = vld [vmem:[%s967_s1 + $0x90] sm:$0xff]  ;;  %vm420_vm2 = vcmask 261120   ;;  %vm432_vm3 = vcmask 7168  }
   0x2   :  { %v37_v2 = vld [vmem:[%s967_s1] sm:$0xff]  ;;  %v588_v5 = vpack.c.bf16 %v54_v1, %v53_v0  ;;  %v38_v6 = vld [vmem:[%s967_s1 + $0x8] sm:$0xff]  ;;  %v56_v8 = vld [vmem:[%s967_s1 + $0x98] sm:$0xff] }
   0x3   :  { %v590_v9 = vpack.c.bf16 %v38_v6, %v37_v2  ;;  %v592_v10 = vpack.c.bf16 %v56_v8, %v55_v7  ;;  %v39_v11 = vld [vmem:[%s967_s1 + $0x10] sm:$0xff]  ;;  %v40_v12 = vld [vmem:[%s967_s1 + $0x18] sm:$0xff]  ;;  %v57_v13 = vld [vmem:[%s967_s1 + $0xa0] sm:$0xff] }
   0x4   :  { %589 = vmatprep.subr.bf16.mxu0 %v588_v5  ;;  %v58_v14 = vld [vmem:[%s967_s1 + $0xa8] sm:$0xff]  ;;  %v594_v15 = vpack.c.bf16 %v40_v12, %v39_v11  ;;  %v41_v17 = vld [vmem:[%s967_s1 + $0x20] sm:$0xff]  ;;  %v59_v19 = vld [vmem:[%s967_s1 + $0xb0] sm:$0xff] }
   0x5   :  { %591 = vmatpush3.bf16.msra.mxu0 %v590_v9  ;;  %v596_v16 = vpack.c.bf16 %v58_v14, %v57_v13  ;;  %v42_v18 = vld [vmem:[%s967_s1 + $0x28] sm:$0xff]  ;;  %v60_v20 = vld [vmem:[%s967_s1 + $0xb8] sm:$0xff]  ;;  %v69_v22 = vld [vmem:[%s967_s1 + $0x100] sm:$0xff] }
   0x6   :  { %593 = vmatprep.subr.bf16.mxu0 %v592_v10  ;;  %v598_v21 = vpack.c.bf16 %v42_v18, %v41_v17  ;;  %v70_v23 = vld [vmem:[%s967_s1 + $0x108] sm:$0xff]  ;;  %v600_v24 = vpack.c.bf16 %v60_v20, %v59_v19  ;;  %v43_v25 = vld [vmem:[%s967_s1 + $0x30] sm:$0xff]  ;;  %v44_v26 = vld [vmem:[%s967_s1 + $0x38] sm:$0xff] }
   0x7   :  { %v61_v27 = vld [vmem:[%s967_s1 + $0xc0] sm:$0xff]  ;;  %v621_v28 = vpack.c.bf16 %v70_v23, %v69_v22  ;;  %v62_v29 = vld [vmem:[%s967_s1 + $0xc8] sm:$0xff]  ;;  %v71_v30 = vld [vmem:[%s967_s1 + $0x110] sm:$0xff]  ;;  %v602_v33 = vpack.c.bf16 %v44_v26, %v43_v25 }
   0x8   :  { %v72_v31 = vld [vmem:[%s967_s1 + $0x118] sm:$0xff]  ;;  %v73_v34 = vld [vmem:[%s967_s1 + $0x120] sm:$0xff]  ;;  %v74_v35 = vld [vmem:[%s967_s1 + $0x128] sm:$0xff]  ;;  %v604_v37 = vpack.c.bf16 %v62_v29, %v61_v27 }
   0x9   :  { %595 = vmatpush3.bf16.msra.mxu0 %v594_v15  ;;  %622 = vmatpush3.bf16.msra.mxu1 %v621_v28  ;;  %v624_v32 = vpack.c.bf16 %v72_v31, %v71_v30  ;;  %v35_v36 = vld [vmem:[%s968_s0 + $0x8] sm:$0xff]  ;;  %v45_v38 = vld [vmem:[%s967_s1 + $0x40] sm:$0xff]  ;;  %v63_v40 = vld [vmem:[%s967_s1 + $0xd0] sm:$0xff]  ;;  %v627_v42 = vpack.c.bf16 %v74_v35, %v73_v34 }
   0xa   :  { %597 = vmatprep.subr.bf16.mxu0 %v596_v16  ;;  %623 = vmatprep.subr.bf16.mxu1 %v671_v3  ;;  %v46_v39 = vld [vmem:[%s967_s1 + $0x48] sm:$0xff]  ;;  %v64_v41 = vld [vmem:[%s967_s1 + $0xd8] sm:$0xff]  ;;  %v75_v44 = vld [vmem:[%s967_s1 + $0x130] sm:$0xff] }
   0xb   :  { %152 = vmatprep.mubr.f32.mxu0 %v35_v36  ;;  %v606_v43 = vpack.c.bf16 %v46_v39, %v45_v38  ;;  %v76_v45 = vld [vmem:[%s967_s1 + $0x138] sm:$0xff]  ;;  %v608_v46 = vpack.c.bf16 %v64_v41, %v63_v40  ;;  %v47_v47 = vld [vmem:[%s967_s1 + $0x50] sm:$0xff]  ;;  %v65_v49 = vld [vmem:[%s967_s1 + $0xe0] sm:$0xff] }
   0xc   :  { %v48_v48 = vld [vmem:[%s967_s1 + $0x58] sm:$0xff]  ;;  %v66_v50 = vld [vmem:[%s967_s1 + $0xe8] sm:$0xff]  ;;  %v630_v51 = vpack.c.bf16 %v76_v45, %v75_v44  ;;  %v229_v53 = vld [vmem:[%s969_s3] sm:$0xff] }
   0xd   :  { %599 = vmatpush3.bf16.msra.mxu0 %v598_v21  ;;  %625 = vmatpush3.bf16.msra.mxu1 %v624_v32  ;;  %v610_v52 = vpack.c.bf16 %v48_v48, %v47_v47  ;;  %v230_v54 = vld [vmem:[%s969_s3 + $0x8] sm:$0xff]  ;;  %v612_v55 = vpack.c.bf16 %v66_v50, %v65_v49  ;;  %v49_v56 = vld [vmem:[%s967_s1 + $0x60] sm:$0xff]  ;;  %v67_v58 = vld [vmem:[%s967_s1 + $0xf0] sm:$0xff] }
   0xe   :  { %601 = vmatprep.subr.bf16.mxu0 %v600_v24  ;;  %626 = vmatprep.subr.bf16.mxu1 %v671_v3  ;;  %v50_v57 = vld [vmem:[%s967_s1 + $0x68] sm:$0xff]  ;;  %v68_v59 = vld [vmem:[%s967_s1 + $0xf8] sm:$0xff]  ;;  %v36_v60 = vld [vmem:[%s968_s0 + $0x10] sm:$0xff]  ;;  %v633_v61 = vpack.c.bf16 %v230_v54, %v229_v53 }
   0xf   :  { %v614_v62 = vpack.c.bf16 %v50_v57, %v49_v56  ;;  %v231_v63 = vld [vmem:[%s969_s3 + $0x10] sm:$0xff]  ;;  %v232_v0 = vld [vmem:[%s969_s3 + $0x18] sm:$0xff]  ;;  %v616_v1 = vpack.c.bf16 %v68_v59, %v67_v58  ;;  %v34_v8 = vld [vmem:[%s968_s0] sm:$0xff] }
  0x10   :  { %v51_v2 = vld [vmem:[%s967_s1 + $0x70] sm:$0xff]  ;;  %v52_v5 = vld [vmem:[%s967_s1 + $0x78] sm:$0xff]  ;;  %v636_v6 = vpack.c.bf16 %v232_v0, %v231_v63  ;;  %v233_v9 = vld [vmem:[%s969_s3 + $0x20] sm:$0xff] }
  0x11   :  { %603 = vmatpush3.bf16.msra.mxu0 %v602_v33  ;;  %628 = vmatpush3.bf16.msra.mxu1 %v627_v42  ;;  %v618_v7 = vpack.c.bf16 %v52_v5, %v51_v2  ;;  %v234_v10 = vld [vmem:[%s969_s3 + $0x28] sm:$0xff]  ;;  %v235_v12 = vld [vmem:[%s969_s3 + $0x30] sm:$0xff]  ;;  %v318_v14 = vld [vmem:[%s970_s5] sm:$0xff] }
  0x12   :  { %605 = vmatprep.subr.bf16.mxu0 %v604_v37  ;;  %629 = vmatprep.subr.bf16.mxu1 %v671_v3  ;;  %v639_v11 = vpack.c.bf16 %v234_v10, %v233_v9  ;;  %v319_v15 = vld [vmem:[%s970_s5 + $0x8] sm:$0xff]  ;;  %v320_v16 = vld [vmem:[%s970_s5 + $0x10] sm:$0xff]  ;;  %v321_v18 = vld [vmem:[%s970_s5 + $0x18] sm:$0xff] }
  0x13   :  { %v645_v17 = vpack.c.bf16 %v319_v15, %v318_v14  ;;  %v648_v19 = vpack.c.bf16 %v321_v18, %v320_v16  ;;  %v322_v20 = vld [vmem:[%s970_s5 + $0x20] sm:$0xff]  ;;  %v323_v21 = vld [vmem:[%s970_s5 + $0x28] sm:$0xff]  ;;  %v324_v23 = vld [vmem:[%s970_s5 + $0x30] sm:$0xff] }
  0x14   :  { %v651_v22 = vpack.c.bf16 %v323_v21, %v322_v20  ;;  %v325_v24 = vld [vmem:[%s970_s5 + $0x38] sm:$0xff]  ;;  %v326_v26 = vld [vmem:[%s970_s5 + $0x40] sm:$0xff]  ;;  %v327_v27 = vld [vmem:[%s970_s5 + $0x48] sm:$0xff] }
  0x15   :  { %607 = vmatpush3.bf16.msra.mxu0 %v606_v43  ;;  %631 = vmatpush3.bf16.msra.mxu1 %v630_v51  ;;  %v654_v25 = vpack.c.bf16 %v325_v24, %v324_v23  ;;  %v657_v28 = vpack.c.bf16 %v327_v27, %v326_v26  ;;  %v328_v29 = vld [vmem:[%s970_s5 + $0x50] sm:$0xff]  ;;  %v329_v30 = vld [vmem:[%s970_s5 + $0x58] sm:$0xff]  ;;  %v330_v32 = vld [vmem:[%s970_s5 + $0x60] sm:$0xff]  ;;  %v14_v51 = vstv %s973_s8 }
  0x16   :  { %609 = vmatprep.subr.bf16.mxu0 %v608_v46  ;;  %632 = vmatprep.subr.bf16.mxu1 %v671_v3  ;;  %v660_v31 = vpack.c.bf16 %v329_v30, %v328_v29  ;;  %v331_v33 = vld [vmem:[%s970_s5 + $0x68] sm:$0xff]  ;;  %v438_v39 = vld [vmem:[%s971_s2] ss:$0 sm:$0xff]  ;;  %v332_v44 = vld [vmem:[%s970_s5 + $0x70] sm:$0xff]  ;;  %15 = vst [vmem:[#allocation2] sm:$0x1] %v14_v51 }
  0x17   :  { %v663_v34 = vpack.c.bf16 %v331_v33, %v330_v32  ;;  %v440_v46 = vld [vmem:[%s972_s4] ss:$0 sm:$0xff] }
  0x18   :  { %532 = vmatmul.mubr.msk.f32.vlgmr.msra.gmra.mrb[0].mxu1 %vm84_vm1, %v36_v60  ;;  %v443_v56 = vld [vmem:[%s975_s7] ss:$0 sm:$0xff] }
  0x19   :  { %611 = vmatpush3.bf16.msra.mxu0 %v610_v52  ;;  %634 = vmatpush3.bf16.msra.mxu1 %v633_v61  ;;  %v442_v52 = vld [vmem:[%s974_s6] ss:$0 sm:$0xff] }
  0x1a   :  { %613 = vmatprep.subr.bf16.mxu0 %v612_v55  ;;  %550 = vmatprep.mubr.msk.f32.mxu1 %vm672_vm0, %v673_v4 }
  0x1b   :  { %635 = vmatprep.subr.bf16.mxu1 %v671_v3 }
  0x1d   :  { %615 = vmatpush3.bf16.msra.mxu0 %v614_v62  ;;  %637 = vmatpush3.bf16.msra.mxu1 %v636_v6  ;;  %v444_v60 = vld [vmem:[#allocation2] ss:$0 sm:$0xff] }
  0x1e   :  { %617 = vmatprep.subr.bf16.mxu0 %v616_v1  ;;  %638 = vmatprep.subr.bf16.mxu1 %v671_v3 }
  0x21   :  { %619 = vmatpush3.bf16.msra.mxu0 %v618_v7  ;;  %640 = vmatpush3.bf16.msra.mxu1 %v639_v11 }
  0x22   :  { %644 = vmatprep.subr.bf16.mxu0 %v671_v3  ;;  %641 = vmatprep.subr.bf16.mxu1 %v671_v3 }
  0x24   :  { %153 = vmatmul.mubr.f32.vlgmr.msra.gmra.mrb[0].mxu0 %v34_v8 }
  0x25   :  { %585 = vmatprep.mubr.msk.f32.mxu0 %vm672_vm0, %v673_v4  ;;  %v236_v4 = vld [vmem:[%s969_s3 + $0x38] sm:$0xff]  ;;  %646 = vmatpush3.bf16.msra.mxu0 %v645_v17 }
  0x26   :  { %v642_v13 = vpack.c.bf16 %v236_v4, %v235_v12  ;;  %647 = vmatprep.subr.bf16.mxu0 %v671_v3 }
  0x28   :  { %643 = vmatpush3.bf16.msra.mxu1 %v642_v13 }
  0x29   :  { %649 = vmatpush3.bf16.msra.mxu0 %v648_v19 }
  0x2a   :  { %650 = vmatprep.subr.bf16.mxu0 %v671_v3 }
  0x2d   :  { %652 = vmatpush3.bf16.msra.mxu0 %v651_v22 }
  0x2e   :  { %653 = vmatprep.subr.bf16.mxu0 %v671_v3 }
  0x31   :  { %655 = vmatpush3.bf16.msra.mxu0 %v654_v25 }
  0x32   :  { %656 = vmatprep.subr.bf16.mxu0 %v671_v3 }
  0x35   :  { %658 = vmatpush3.bf16.msra.mxu0 %v657_v28 }
  0x36   :  { %659 = vmatprep.subr.bf16.mxu0 %v671_v3 }
  0x39   :  { %661 = vmatpush3.bf16.msra.mxu0 %v660_v31 }
  0x3a   :  { %662 = vmatprep.subr.bf16.mxu0 %v671_v3 }
  0x3d   :  { %664 = vmatpush3.bf16.msra.mxu0 %v663_v34 }
  0x3e   :  { %665 = vmatprep.subr.bf16.mxu0 %v671_v3  ;;  %v333_v3 = vld [vmem:[%s970_s5 + $0x78] sm:$0xff] }
  0x3f   :  { %v666_v45 = vpack.c.bf16 %v333_v3, %v332_v44 }
  0x41   :  { %667 = vmatpush3.bf16.msra.mxu0 %v666_v45 }
  0xeb   :  { %v224_v35 = vpop.f32.mrb[0].mxu1 }
  0xec   :  { %v533_v36 = vpop.f32.mrb[1].mxu1 }
  0xf7   :  { %v477_v37 = vpop.f32.mrb[0].mxu0 }
  0xf8   :  { %v478_v38 = vpop.f32.mrb[1].mxu0 }
  0xf9   :  { %v479_v40 = vadd.f32 %v478_v38, %v477_v37 }
  0xfb   :  { %v155_v41 = vadd.f32 %v479_v40, %v438_v39 }
  0xfd   :  { %v225_v42 = vadd.f32 %v224_v35, %v155_v41 }
  0xff   :  { %v228_v43 = vmax.f32 %v225_v42, 0.0 }
 0x101   :  { %551 = vmatmul.mubr.msk.f32.vlgmr.msra.gmra.mrb[2].mxu1 %vm84_vm1, %v228_v43 }
 0x1d4   :  { %v313_v47 = vpop.f32.mrb[2].mxu1 }
 0x1d5   :  { %v314_v48 = vadd.f32 %v440_v46, %v313_v47  ;;  %v552_v49 = vpop.f32.mrb[3].mxu1 }
 0x1d7   :  { %v317_v50 = vmax.f32 %v314_v48, 0.0 }
 0x1d9   :  { %586 = vmatmul.mubr.f32.vlgmr.msra.gmra.mrb[2].mxu0 %v317_v50 }
 0x2ac   :  { %v407_v53 = vpop.f32.mrb[2].mxu0 }
 0x2ad   :  { %v408_v54 = vadd.f32 %v442_v52, %v407_v53  ;;  %v587_v55 = vpop.f32.mrb[3].mxu0 }
 0x2af   :  { %v411_v57 = vmax.f32 %v408_v54, 0.0 }
 0x2b1   :  { %v419_v58 = vmul.f32 %v443_v56, %v411_v57 }
 0x2b3   :  { %v421_v59 = vsel %vm420_vm2, %v419_v58, 0.0 }
 0x2b4   :  { %422 = vadd.xlane.f32.xlu0 %v421_v59 }
 0x341   :  { %v423_v61 = vpop.xlane.xlu0 %422 }
 0x342   :  { %v431_v62 = vadd.f32 %v444_v60, %v423_v61 }
 0x344   :  { %433 = vst.msk [vmem:[%s976_s9] sm:$0xff] %vm432_vm3, %v431_v62 }

</bundles_post_ra>
